<compile_context>
chip_gen: v7x
topology: tpu7x:2x2x1
jax: 0.10.0
libtpu: 0.0.40
codegen_flags: <defaults>
</compile_context>

<pallas_src>
import functools

import jax
import jax.numpy as jnp
from jax.experimental import pallas as pl
from jax.experimental.pallas import tpu as pltpu

F32 = jnp.float32
BF16 = jnp.bfloat16


def _round_up(x, m):
    return (x + m - 1) // m * m


def _vmem_cap_bytes():
    try:
        info = pltpu.get_tpu_info()
        for name in ("vmem_capacity_bytes", "vmem_bytes", "vmem_size_bytes"):
            v = getattr(info, name, None)
            if v:
                return int(v)
    except Exception:
        pass
    return 64 << 20  # conservative: v7x physical VMEM per TensorCore


def _compiler_params(dim_sems, est_bytes):
    cap = _vmem_cap_bytes()
    # Explicit limit also covers v5e's small (16 MiB) default scoped VMEM.
    limit = int(min(cap * 9 // 10, max(2 * est_bytes + (4 << 20), 32 << 20)))
    return pltpu.CompilerParams(dimension_semantics=dim_sems,
                                vmem_limit_bytes=limit)


def _divisor_tile(total, candidates):
    for c in candidates:
        if c <= total and total % c == 0:
            return c
    return total


def _mm(a, b):
    """MXU matmul, f32 accumulation. b is pre-cast bf16; a cast iff f32 interm."""
    return jnp.dot(a.astype(BF16), b, preferred_element_type=F32)


# --------------------------------------------------------------------------- #
# Kernels
# --------------------------------------------------------------------------- #
def _node_local_kernel(x_ref, w1_ref, wm1_ref, bm1_ref, wmlp_ref, bmlp_ref,
                       wd1_ref, bd1_ref, wd2_ref, bd2_ref,
                       xw1_ref, muxlvx_ref, feat_ref, *, latent):
    x = x_ref[...]  # already bf16 (cast once on the host)

    # GCN layer 1, node-local half: X @ W1 (aggregation + bias in pass 2).
    xw1_ref[...] = _mm(x, w1_ref[...]).astype(BF16)

    # MLP variational encoder (mu_x | logvar_x heads fused into one matmul).
    hx = jnp.maximum(_mm(x, wm1_ref[...]) + bm1_ref[...], 0.0)
    muxlvx = _mm(hx, wmlp_ref[...]) + bmlp_ref[...]
    muxlvx_ref[...] = muxlvx

    # Feature decoder acts on zx = mu_x (eval-mode reparameterization).
    zx = muxlvx[:, :latent]
    hd = jax.nn.sigmoid(_mm(zx, wd1_ref[...]) + bd1_ref[...])
    feat_ref[...] = _mm(hd, wd2_ref[...]) + bd2_ref[...]


def _gcn_agg1_kernel(adj_ref, xw1_ref, b1_ref, wgcn_ref, hw_ref, acc_ref):
    # Accumulate A @ (X W1) over the adj-column (k) grid axis.
    k = pl.program_id(1)

    @pl.when(k == 0)
    def _():
        acc_ref[...] = jnp.zeros_like(acc_ref)

    acc_ref[...] += jnp.dot(adj_ref[...], xw1_ref[...],
                            preferred_element_type=F32)

    @pl.when(k == pl.num_programs(1) - 1)
    def _():
        # h = relu(A @ XW1 + b1) ;  HW = h @ [Wmu | Wlogvar]  (fused heads)
        h = jnp.maximum(acc_ref[...] + b1_ref[...], 0.0)
        hw_ref[...] = _mm(h, wgcn_ref[...]).astype(BF16)


def _gcn_agg2_kernel(adj_ref, hw_ref, bgcn_ref, muxlvx_ref,
                     wpa_ref, wpx_ref, bp_ref,
                     slab_ref, zb_ref, acc_ref, *, latent, slab_pad):
    k = pl.program_id(1)

    @pl.when(k == 0)
    def _():
        acc_ref[...] = jnp.zeros_like(acc_ref)

    # Accumulate A @ (h [Wmu|Wlv]) over the adj-column (k) grid axis.
    acc_ref[...] += jnp.dot(adj_ref[...], hw_ref[...],
                            preferred_element_type=F32)

    @pl.when(k == pl.num_programs(1) - 1)
    def _():
        L = latent
        mualv_a = acc_ref[...] + bgcn_ref[...]
        mu_a, lv_a = mualv_a[:, :L], mualv_a[:, L:]

        muxlvx = muxlvx_ref[...]
        mu_x, lv_x = muxlvx[:, :L], muxlvx[:, L:]

        # eval-mode reparameterize -> means; z = [za | zx] is never built with
        # a standalone lane concat store: consumers use split weights.
        za, zx = mu_a, mu_x

        # predlabel head (parent class): softmax(z @ Wp + bp), Wp pre-split.
        logits = _mm(za, wpa_ref[...]) + _mm(zx, wpx_ref[...]) + bp_ref[...]
        logits = logits - jnp.max(logits, axis=1, keepdims=True)
        e = jnp.exp(logits)
        pred = e / jnp.sum(e, axis=1, keepdims=True)   # exact (tiny tensor)

        # One lane-dense full-width store (no zero-fill + masked slice stores):
        #   [ mu_a | mu_x | logvar_a | logvar_x | pred | 0-pad ]
        # (columns 0:2L are exactly z = [za | zx]).
        pieces = [mu_a, mu_x, lv_a, lv_x, pred]
        if slab_pad:
            pieces.append(jnp.zeros((mu_a.shape[0], slab_pad), F32))
        slab_ref[...] = jnp.concatenate(pieces, axis=1)

        # bf16 copy of z used by the inner-product adjacency-decoder pass.
        zb_ref[...] = jnp.concatenate([za, zx], axis=1).astype(BF16)


def _adj_recon_kernel(zi_ref, zj_ref, out_ref):
    # adj_recon[i-tile, j-tile] = z_i @ z_j.T  (contract the 2L latent lanes);
    # stored in bf16 to halve the O(N^2) HBM writeback.
    out_ref[...] = jax.lax.dot_general(
        zi_ref[...], zj_ref[...],
        dimension_numbers=(((1,), (1,)), ((), ())),
        preferred_element_type=F32).astype(out_ref.dtype)


# --------------------------------------------------------------------------- #
# Host-side preparation (do once, reuse across forward calls)
# --------------------------------------------------------------------------- #
def build_plan(n, *, num_features, nhid, latent, num_classes):
    cap = _vmem_cap_bytes()
    base = 512 if cap >= (100 << 20) else 256   # v5e/v6e: 512, v7x: 256
    if n <= base:
        row_tile = _round_up(max(n, 8), 8)
    else:
        row_tile = base
    n_pad = _round_up(n, row_tile)
    return dict(
        n=n, n_pad=n_pad, row_tile=row_tile,
        # pass 1 uses its own (larger) row tile: footprint is only tile x F.
        p1_tile=_divisor_tile(n_pad, (1024, 512, 256)),
        # adj-column (contraction) tile for passes 2-3: bounds VMEM vs N.
        k_tile=_divisor_tile(n_pad, (4096, 2048, 1024, 512, 256, 128)),
        # wide output-column tile for pass 4: fewer steps, big contiguous DMAs.
        col_tile=_divisor_tile(n_pad, (2048, 1024, 512, 256, 128)),
        num_features=num_features, nhid=nhid, latent=latent,
        num_classes=num_classes,
        slab_w=_round_up(4 * latent + num_classes, 128),
    )


def prepare_adj(adj, plan):
    """Cast + zero-pad the normalized dense adjacency ONCE (cache across calls).

    This avoids re-materializing the O(N^2) bf16 copy on every forward call.
    """
    n, n_pad = plan["n"], plan["n_pad"]
    return jnp.zeros((n_pad, n_pad), BF16).at[:n, :n].set(adj.astype(BF16))


def prepare_params(params, plan):
    """Fuse mu/logvar heads, split the pred weight, pre-cast weights to bf16."""
    L = plan["latent"]
    b16 = lambda a: a.astype(BF16)
    return {
        "w1": b16(params["gc1_w"]),
        "b1": params["gc1_b"].astype(F32),
        "wgcn": b16(jnp.concatenate([params["gc_mu_w"], params["gc_lv_w"]], axis=1)),
        "bgcn": jnp.concatenate([params["gc_mu_b"], params["gc_lv_b"]], axis=1).astype(F32),
        "wm1": b16(params["mlp1_w"]),
        "bm1": params["mlp1_b"].astype(F32),
        "wmlp": b16(jnp.concatenate([params["mlp_mu_w"], params["mlp_lv_w"]], axis=1)),
        "bmlp": jnp.concatenate([params["mlp_mu_b"], params["mlp_lv_b"]], axis=1).astype(F32),
        "wd1": b16(params["dec1_w"]),
        "bd1": params["dec1_b"].astype(F32),
        "wd2": b16(params["dec2_w"]),
        "bd2": params["dec2_b"].astype(F32),
        "wp_a": b16(params["pred_w"][:L, :]),   # matches z = [za | zx] order
        "wp_x": b16(params["pred_w"][L:, :]),
        "bp": params["pred_b"].astype(F32),
    }


# --------------------------------------------------------------------------- #
# Forward
# --------------------------------------------------------------------------- #
def vsepa_forward(x, adj_p, prep, plan):
    """Eval-mode forward. x: [N, F]; adj_p: prepared bf16 padded adjacency."""
    n, n_pad = plan["n"], plan["n_pad"]
    f, nhid = plan["num_features"], plan["nhid"]
    L, C = plan["latent"], plan["num_classes"]
    two_l = 2 * L
    slab_w = plan["slab_w"]
    rt, p1t, kt, ct = plan["row_tile"], plan["p1_tile"], plan["k_tile"], plan["col_tile"]
    g, g1, kg, gj = n_pad // rt, n_pad // p1t, n_pad // kt, n_pad // ct

    x_p = jnp.zeros((n_pad, f), BF16).at[:n, :].set(x.astype(BF16))

    # Constant-index weight/bias blocks are tiny (K-tiling removed the large
    # resident arrays), so default multi-buffering of them is negligible.
    full = lambda arr: pl.BlockSpec(arr.shape, lambda *_: (0, 0))

    weight_bytes = sum(int(v.size) * v.dtype.itemsize for v in prep.values())

    # ---- pass 1: node-local matmuls (X@W1, MLP encoder, feature decoder) ----
    est1 = 2 * p1t * (2 * f + 2 * nhid + 4 * two_l + 4 * f) + weight_bytes
    xw1, muxlvx, feat_recon_p = pl.pallas_call(
        functools.partial(_node_local_kernel, latent=L),
        grid=(g1,),
        in_specs=[
            pl.BlockSpec((p1t, f), lambda i: (i, 0)),
            full(prep["w1"]),
            full(prep["wm1"]), full(prep["bm1"]),
            full(prep["wmlp"]), full(prep["bmlp"]),
            full(prep["wd1"]), full(prep["bd1"]),
            full(prep["wd2"]), full(prep["bd2"]),
        ],
        out_specs=[
            pl.BlockSpec((p1t, nhid), lambda i: (i, 0)),
            pl.BlockSpec((p1t, two_l), lambda i: (i, 0)),
            pl.BlockSpec((p1t, f), lambda i: (i, 0)),
        ],
        out_shape=[
            jax.ShapeDtypeStruct((n_pad, nhid), BF16),
            jax.ShapeDtypeStruct((n_pad, two_l), F32),
            jax.ShapeDtypeStruct((n_pad, f), F32),
        ],
        compiler_params=_compiler_params(("parallel",), est1),
    )(x_p, prep["w1"], prep["wm1"], prep["bm1"], prep["wmlp"], prep["bmlp"],
      prep["wd1"], prep["bd1"], prep["wd2"], prep["bd2"])

    # ---- pass 2: first adjacency aggregation, K-tiled contraction -----------
    est2 = (2 * (2 * rt * kt + 2 * kt * nhid) + 4 * rt * nhid
            + 2 * 2 * rt * two_l + weight_bytes)
    hw = pl.pallas_call(
        _gcn_agg1_kernel,
        grid=(g, kg),
        in_specs=[
            pl.BlockSpec((rt, kt), lambda i, k: (i, k)),     # adj tile
            pl.BlockSpec((kt, nhid), lambda i, k: (k, 0)),   # X@W1 k-slice
            full(prep["b1"]),
            full(prep["wgcn"]),
        ],
        out_specs=pl.BlockSpec((rt, two_l), lambda i, k: (i, 0)),
        out_shape=jax.ShapeDtypeStruct((n_pad, two_l), BF16),
        scratch_shapes=[pltpu.VMEM((rt, nhid), F32)],
        compiler_params=_compiler_params(("parallel", "arbitrary"), est2),
    )(adj_p, xw1, prep["b1"], prep["wgcn"])

    # ---- pass 3: second aggregation (K-tiled) + heads, packed slab output ---
    slab_pad = slab_w - (4 * L + C)
    est3 = (2 * (2 * rt * kt + 2 * kt * two_l) + 4 * rt * two_l
            + 2 * (4 * rt * slab_w + 2 * rt * two_l + 4 * rt * two_l)
            + weight_bytes)
    slab, zb = pl.pallas_call(
        functools.partial(_gcn_agg2_kernel, latent=L, slab_pad=slab_pad),
        grid=(g, kg),
        in_specs=[
            pl.BlockSpec((rt, kt), lambda i, k: (i, k)),     # adj tile
            pl.BlockSpec((kt, two_l), lambda i, k: (k, 0)),  # h@[Wmu|Wlv] slice
            full(prep["bgcn"]),
            pl.BlockSpec((rt, two_l), lambda i, k: (i, 0)),  # [mu_x|lv_x] tile
            full(prep["wp_a"]), full(prep["wp_x"]), full(prep["bp"]),
        ],
        out_specs=[
            pl.BlockSpec((rt, slab_w), lambda i, k: (i, 0)),
            pl.BlockSpec((rt, two_l), lambda i, k: (i, 0)),
        ],
        out_shape=[
            jax.ShapeDtypeStruct((n_pad, slab_w), F32),
            jax.ShapeDtypeStruct((n_pad, two_l), BF16),
        ],
        scratch_shapes=[pltpu.VMEM((rt, two_l), F32)],
        compiler_params=_compiler_params(("parallel", "arbitrary"), est3),
    )(adj_p, hw, prep["bgcn"], muxlvx, prep["wp_a"], prep["wp_x"], prep["bp"])

    # ---- pass 4: inner-product adjacency decoder, wide column tiles, bf16 ---
    est4 = 2 * (2 * rt * two_l + 2 * ct * two_l + 2 * rt * ct)
    adj_recon_p = pl.pallas_call(
        _adj_recon_kernel,
        grid=(g, gj),
        in_specs=[
            pl.BlockSpec((rt, two_l), lambda i, j: (i, 0)),
            pl.BlockSpec((ct, two_l), lambda i, j: (j, 0)),
        ],
        out_specs=pl.BlockSpec((rt, ct), lambda i, j: (i, j)),
        out_shape=jax.ShapeDtypeStruct((n_pad, n_pad), BF16),
        compiler_params=_compiler_params(("parallel", "parallel"), est4),
    )(zb, zb)

    # ---- unpack: strip row padding, slice the packed slab --------------------
    return {
        "adj_recon": adj_recon_p[:n, :n],
        "feat_recon": feat_recon_p[:n, :],
        "pred": slab[:n, 4 * L:4 * L + C],
        "z": slab[:n, 0:2 * L],
        "mu_a": slab[:n, 0:L],
        "mu_x": slab[:n, L:2 * L],
        "logvar_a": slab[:n, 2 * L:3 * L],
        "logvar_x": slab[:n, 3 * L:4 * L],
    }


def init_params(key, num_features, nhid, latent_dim, num_classes):
    """Deterministic synthetic parameters. Weights stored as [in, out]."""
    shapes = {
        "gc1_w": (num_features, nhid), "gc1_b": (1, nhid),
        "gc_mu_w": (nhid, latent_dim), "gc_mu_b": (1, latent_dim),
        "gc_lv_w": (nhid, latent_dim), "gc_lv_b": (1, latent_dim),
        "mlp1_w": (num_features, nhid), "mlp1_b": (1, nhid),
        "mlp_mu_w": (nhid, latent_dim), "mlp_mu_b": (1, latent_dim),
        "mlp_lv_w": (nhid, latent_dim), "mlp_lv_b": (1, latent_dim),
        "dec1_w": (latent_dim, nhid), "dec1_b": (1, nhid),
        "dec2_w": (nhid, num_features), "dec2_b": (1, num_features),
        "pred_w": (2 * latent_dim, num_classes), "pred_b": (1, num_classes),
    }
    params = {}
    for i, (name, shp) in enumerate(sorted(shapes.items())):
        k = jax.random.fold_in(key, i)
        params[name] = (0.1 * jax.random.normal(k, shp)).astype(jnp.float32)
    return params


if __name__ == "__main__":
    # Small, module-consistent shapes (VSEPACATTFN defaults: nhid=32, latent=8).
    N = 8
    NUM_FEATURES = 32
    NHID = 32
    LATENT = 8
    NUM_CLASSES = 4

    root = jax.random.PRNGKey(0)
    k_x, k_adj, k_par = jax.random.split(root, 3)

    x = jax.random.normal(k_x, (N, NUM_FEATURES), dtype=jnp.float32)

    # Symmetric normalized adjacency with self-loops (what GCNConv expects).
    a = (jax.random.uniform(k_adj, (N, N)) > 0.6).astype(jnp.float32)
    a = jnp.maximum(a, a.T)
    a = a.at[jnp.arange(N), jnp.arange(N)].set(1.0)
    deg = jnp.sum(a, axis=1)
    d_inv_sqrt = 1.0 / jnp.sqrt(deg)
    adj = a * d_inv_sqrt[:, None] * d_inv_sqrt[None, :]

    params = init_params(k_par, NUM_FEATURES, NHID, LATENT, NUM_CLASSES)

    # One-time prep (cached across inference calls): plan, bf16 weights, bf16 adj.
    plan = build_plan(N, num_features=NUM_FEATURES, nhid=NHID,
                      latent=LATENT, num_classes=NUM_CLASSES)
    prep = prepare_params(params, plan)
    adj_p = prepare_adj(adj, plan)

    out = vsepa_forward(x, adj_p, prep, plan)
    jax.block_until_ready(out)

    # Light sanity checks (shapes + softmax normalization + finiteness).
    assert out["adj_recon"].shape == (N, N)
    assert out["feat_recon"].shape == (N, NUM_FEATURES)
    assert out["pred"].shape == (N, NUM_CLASSES)
    assert out["z"].shape == (N, 2 * LATENT)
    assert out["mu_a"].shape == (N, LATENT)
    assert out["logvar_x"].shape == (N, LATENT)
    assert bool(jnp.allclose(jnp.sum(out["pred"], axis=1), 1.0, atol=1e-3))
    assert bool(jnp.all(jnp.isfinite(out["adj_recon"].astype(jnp.float32))))

    print("KERNEL_OK")
</pallas_src>

<mosaic_0001>
module attributes {stable_mosaic.version = 11 : i64} {
  func.func @_node_local_kernel(%arg0: i32, %arg1: memref<8x32xbf16, #tpu.memory_space<vmem>>, %arg2: memref<32x32xbf16, #tpu.memory_space<vmem>>, %arg3: memref<32x32xbf16, #tpu.memory_space<vmem>>, %arg4: memref<1x32xf32, #tpu.memory_space<vmem>>, %arg5: memref<32x16xbf16, #tpu.memory_space<vmem>>, %arg6: memref<1x16xf32, #tpu.memory_space<vmem>>, %arg7: memref<8x32xbf16, #tpu.memory_space<vmem>>, %arg8: memref<1x32xf32, #tpu.memory_space<vmem>>, %arg9: memref<32x32xbf16, #tpu.memory_space<vmem>>, %arg10: memref<1x32xf32, #tpu.memory_space<vmem>>, %arg11: memref<8x32xbf16, #tpu.memory_space<vmem>>, %arg12: memref<8x16xf32, #tpu.memory_space<vmem>>, %arg13: memref<8x32xf32, #tpu.memory_space<vmem>>) attributes {dimension_semantics = [#tpu.dimension_semantics<parallel>], iteration_bounds = array<i64: 1>, scalar_prefetch = 0 : i64, scratch_operands = 0 : i64, tpu.core_type = #tpu.core_type<tc>, window_params = [{transform_indices = @transform_0, window_bounds = array<i64: 8, 32>}, {pipeline_mode = #tpu.pipeline_mode<synchronous>, transform_indices = @transform_1, window_bounds = array<i64: 32, 32>}, {pipeline_mode = #tpu.pipeline_mode<synchronous>, transform_indices = @transform_2, window_bounds = array<i64: 32, 32>}, {pipeline_mode = #tpu.pipeline_mode<synchronous>, transform_indices = @transform_3, window_bounds = array<i64: 1, 32>}, {pipeline_mode = #tpu.pipeline_mode<synchronous>, transform_indices = @transform_4, window_bounds = array<i64: 32, 16>}, {pipeline_mode = #tpu.pipeline_mode<synchronous>, transform_indices = @transform_5, window_bounds = array<i64: 1, 16>}, {pipeline_mode = #tpu.pipeline_mode<synchronous>, transform_indices = @transform_6, window_bounds = array<i64: 8, 32>}, {pipeline_mode = #tpu.pipeline_mode<synchronous>, transform_indices = @transform_7, window_bounds = array<i64: 1, 32>}, {pipeline_mode = #tpu.pipeline_mode<synchronous>, transform_indices = @transform_8, window_bounds = array<i64: 32, 32>}, {pipeline_mode = #tpu.pipeline_mode<synchronous>, transform_indices = @transform_9, window_bounds = array<i64: 1, 32>}, {transform_indices = @transform_10, window_bounds = array<i64: 8, 32>}, {transform_indices = @transform_11, window_bounds = array<i64: 8, 16>}, {transform_indices = @transform_12, window_bounds = array<i64: 8, 32>}]} {
    %c0 = arith.constant 0 : index
    %c0_0 = arith.constant 0 : index
    %0 = vector.load %arg1[%c0, %c0_0] : memref<8x32xbf16, #tpu.memory_space<vmem>>, vector<8x32xbf16>
    %c0_1 = arith.constant 0 : index
    %c0_2 = arith.constant 0 : index
    %1 = vector.load %arg2[%c0_1, %c0_2] : memref<32x32xbf16, #tpu.memory_space<vmem>>, vector<32x32xbf16>
    %cst = arith.constant dense<0.000000e+00> : vector<8x32xf32>
    %2 = tpu.matmul %0, %1, %cst {dimension_numbers = #tpu.dot_dimension_numbers<[1], [0], [0], [1], [0, 0, 1, 1], [], []>} : vector<8x32xbf16>, vector<32x32xbf16>, vector<8x32xf32> -> vector<8x32xf32>
    %3 = arith.truncf %2 : vector<8x32xf32> to vector<8x32xbf16>
    %c0_3 = arith.constant 0 : index
    %c0_4 = arith.constant 0 : index
    %4 = vector.load %arg11[%c0_3, %c0_4] : memref<8x32xbf16, #tpu.memory_space<vmem>>, vector<8x32xbf16>
    tpu.vector_store %arg11[%c0_3, %c0_4], %3 {strides = array<i32>} : memref<8x32xbf16, #tpu.memory_space<vmem>>, vector<8x32xbf16>,
    %c0_5 = arith.constant 0 : index
    %c0_6 = arith.constant 0 : index
    %5 = vector.load %arg3[%c0_5, %c0_6] : memref<32x32xbf16, #tpu.memory_space<vmem>>, vector<32x32xbf16>
    %cst_7 = arith.constant dense<0.000000e+00> : vector<8x32xf32>
    %6 = tpu.matmul %0, %5, %cst_7 {dimension_numbers = #tpu.dot_dimension_numbers<[1], [0], [0], [1], [0, 0, 1, 1], [], []>} : vector<8x32xbf16>, vector<32x32xbf16>, vector<8x32xf32> -> vector<8x32xf32>
    %c0_8 = arith.constant 0 : index
    %c0_9 = arith.constant 0 : index
    %7 = vector.load %arg4[%c0_8, %c0_9] : memref<1x32xf32, #tpu.memory_space<vmem>>, vector<1x32xf32>
    %8 = vector.broadcast %7 : vector<1x32xf32> to vector<8x32xf32>
    %9 = arith.addf %6, %8 : vector<8x32xf32>
    %cst_10 = arith.constant 0.000000e+00 : f32
    %10 = vector.broadcast %cst_10 : f32 to vector<8x32xf32>
    %11 = arith.maximumf %9, %10 : vector<8x32xf32>
    %c0_11 = arith.constant 0 : index
    %c0_12 = arith.constant 0 : index
    %12 = vector.load %arg5[%c0_11, %c0_12] : memref<32x16xbf16, #tpu.memory_space<vmem>>, vector<32x16xbf16>
    %13 = arith.truncf %11 : vector<8x32xf32> to vector<8x32xbf16>
    %cst_13 = arith.constant dense<0.000000e+00> : vector<8x16xf32>
    %14 = tpu.matmul %13, %12, %cst_13 {dimension_numbers = #tpu.dot_dimension_numbers<[1], [0], [0], [1], [0, 0, 1, 1], [], []>} : vector<8x32xbf16>, vector<32x16xbf16>, vector<8x16xf32> -> vector<8x16xf32>
    %c0_14 = arith.constant 0 : index
    %c0_15 = arith.constant 0 : index
    %15 = vector.load %arg6[%c0_14, %c0_15] : memref<1x16xf32, #tpu.memory_space<vmem>>, vector<1x16xf32>
    %16 = vector.broadcast %15 : vector<1x16xf32> to vector<8x16xf32>
    %17 = arith.addf %14, %16 : vector<8x16xf32>
    %c0_16 = arith.constant 0 : index
    %c0_17 = arith.constant 0 : index
    %18 = vector.load %arg12[%c0_16, %c0_17] : memref<8x16xf32, #tpu.memory_space<vmem>>, vector<8x16xf32>
    tpu.vector_store %arg12[%c0_16, %c0_17], %17 {strides = array<i32>} : memref<8x16xf32, #tpu.memory_space<vmem>>, vector<8x16xf32>,
    %19 = vector.extract_strided_slice %17 {offsets = [0, 0], sizes = [8, 8], strides = [1, 1]} : vector<8x16xf32> to vector<8x8xf32>
    %c0_18 = arith.constant 0 : index
    %c0_19 = arith.constant 0 : index
    %20 = vector.load %arg7[%c0_18, %c0_19] : memref<8x32xbf16, #tpu.memory_space<vmem>>, vector<8x32xbf16>
    %21 = arith.truncf %19 : vector<8x8xf32> to vector<8x8xbf16>
    %cst_20 = arith.constant dense<0.000000e+00> : vector<8x32xf32>
    %22 = tpu.matmul %21, %20, %cst_20 {dimension_numbers = #tpu.dot_dimension_numbers<[1], [0], [0], [1], [0, 0, 1, 1], [], []>} : vector<8x8xbf16>, vector<8x32xbf16>, vector<8x32xf32> -> vector<8x32xf32>
    %c0_21 = arith.constant 0 : index
    %c0_22 = arith.constant 0 : index
    %23 = vector.load %arg8[%c0_21, %c0_22] : memref<1x32xf32, #tpu.memory_space<vmem>>, vector<1x32xf32>
    %24 = vector.broadcast %23 : vector<1x32xf32> to vector<8x32xf32>
    %25 = arith.addf %22, %24 : vector<8x32xf32>
    %26 = arith.negf %25 : vector<8x32xf32>
    %27 = math.exp %26 : vector<8x32xf32>
    %cst_23 = arith.constant 1.000000e+00 : f32
    %28 = vector.broadcast %cst_23 : f32 to vector<8x32xf32>
    %29 = arith.addf %28, %27 : vector<8x32xf32>
    %30 = arith.divf %28, %29 : vector<8x32xf32>
    %c0_24 = arith.constant 0 : index
    %c0_25 = arith.constant 0 : index
    %31 = vector.load %arg9[%c0_24, %c0_25] : memref<32x32xbf16, #tpu.memory_space<vmem>>, vector<32x32xbf16>
    %32 = arith.truncf %30 : vector<8x32xf32> to vector<8x32xbf16>
    %cst_26 = arith.constant dense<0.000000e+00> : vector<8x32xf32>
    %33 = tpu.matmul %32, %31, %cst_26 {dimension_numbers = #tpu.dot_dimension_numbers<[1], [0], [0], [1], [0, 0, 1, 1], [], []>} : vector<8x32xbf16>, vector<32x32xbf16>, vector<8x32xf32> -> vector<8x32xf32>
    %c0_27 = arith.constant 0 : index
    %c0_28 = arith.constant 0 : index
    %34 = vector.load %arg10[%c0_27, %c0_28] : memref<1x32xf32, #tpu.memory_space<vmem>>, vector<1x32xf32>
    %35 = vector.broadcast %34 : vector<1x32xf32> to vector<8x32xf32>
    %36 = arith.addf %33, %35 : vector<8x32xf32>
    %c0_29 = arith.constant 0 : index
    %c0_30 = arith.constant 0 : index
    %37 = vector.load %arg13[%c0_29, %c0_30] : memref<8x32xf32, #tpu.memory_space<vmem>>, vector<8x32xf32>
    tpu.vector_store %arg13[%c0_29, %c0_30], %36 {strides = array<i32>} : memref<8x32xf32, #tpu.memory_space<vmem>>, vector<8x32xf32>,
    return
  }
  func.func @transform_0(%arg0: i32) -> (i32, i32) {
    %c0_i32 = arith.constant 0 : i32
    %c0_i32_0 = arith.constant 0 : i32
    return %arg0, %c0_i32 : i32, i32
  }
  func.func @transform_1(%arg0: i32) -> (i32, i32) {
    %c0_i32 = arith.constant 0 : i32
    %c0_i32_0 = arith.constant 0 : i32
    %c0_i32_1 = arith.constant 0 : i32
    return %c0_i32, %c0_i32_0 : i32, i32
  }
  func.func @transform_2(%arg0: i32) -> (i32, i32) {
    %c0_i32 = arith.constant 0 : i32
    %c0_i32_0 = arith.constant 0 : i32
    %c0_i32_1 = arith.constant 0 : i32
    return %c0_i32, %c0_i32_0 : i32, i32
  }
  func.func @transform_3(%arg0: i32) -> (i32, i32) {
    %c0_i32 = arith.constant 0 : i32
    %c0_i32_0 = arith.constant 0 : i32
    %c0_i32_1 = arith.constant 0 : i32
    return %c0_i32, %c0_i32_0 : i32, i32
  }
  func.func @transform_4(%arg0: i32) -> (i32, i32) {
    %c0_i32 = arith.constant 0 : i32
    %c0_i32_0 = arith.constant 0 : i32
    %c0_i32_1 = arith.constant 0 : i32
    return %c0_i32, %c0_i32_0 : i32, i32
  }
  func.func @transform_5(%arg0: i32) -> (i32, i32) {
    %c0_i32 = arith.constant 0 : i32
    %c0_i32_0 = arith.constant 0 : i32
    %c0_i32_1 = arith.constant 0 : i32
    return %c0_i32, %c0_i32_0 : i32, i32
  }
  func.func @transform_6(%arg0: i32) -> (i32, i32) {
    %c0_i32 = arith.constant 0 : i32
    %c0_i32_0 = arith.constant 0 : i32
    %c0_i32_1 = arith.constant 0 : i32
    return %c0_i32, %c0_i32_0 : i32, i32
  }
  func.func @transform_7(%arg0: i32) -> (i32, i32) {
    %c0_i32 = arith.constant 0 : i32
    %c0_i32_0 = arith.constant 0 : i32
    %c0_i32_1 = arith.constant 0 : i32
    return %c0_i32, %c0_i32_0 : i32, i32
  }
  func.func @transform_8(%arg0: i32) -> (i32, i32) {
    %c0_i32 = arith.constant 0 : i32
    %c0_i32_0 = arith.constant 0 : i32
    %c0_i32_1 = arith.constant 0 : i32
    return %c0_i32, %c0_i32_0 : i32, i32
  }
  func.func @transform_9(%arg0: i32) -> (i32, i32) {
    %c0_i32 = arith.constant 0 : i32
    %c0_i32_0 = arith.constant 0 : i32
    %c0_i32_1 = arith.constant 0 : i32
    return %c0_i32, %c0_i32_0 : i32, i32
  }
  func.func @transform_10(%arg0: i32) -> (i32, i32) {
    %c0_i32 = arith.constant 0 : i32
    %c0_i32_0 = arith.constant 0 : i32
    return %arg0, %c0_i32 : i32, i32
  }
  func.func @transform_11(%arg0: i32) -> (i32, i32) {
    %c0_i32 = arith.constant 0 : i32
    %c0_i32_0 = arith.constant 0 : i32
    return %arg0, %c0_i32 : i32, i32
  }
  func.func @transform_12(%arg0: i32) -> (i32, i32) {
    %c0_i32 = arith.constant 0 : i32
    %c0_i32_0 = arith.constant 0 : i32
    return %arg0, %c0_i32 : i32, i32
  }
}

</mosaic_0001>

<bundles_post_ra>
// kernel: tpu_custom_call.1
= control target key start
LH: loop header
LB: loop body
LE: loop exit
PB: predicated region body
PF: predicated region fallthrough
CT: control target
= control target key end

     0   :  { %18 = vsyncpa [#allocation3], 0  ;;  %s845_s0 = inlined_call_operand.hbm [shape: bf16[8,32], index: 0, kind: input, shape index: {}]   ;;  %s846_s1 = inlined_call_operand.vmem [shape: bf16[32,32], index: 1, kind: input, shape index: {}]   ;;  %s847_s2 = inlined_call_operand.hbm [shape: bf16[32,32], index: 2, kind: input, shape index: {}]   ;;  %s848_s3 = inlined_call_operand.vmem [shape: f32[1,32], index: 3, kind: input, shape index: {}]   ;;  %s849_s4 = inlined_call_operand.vmem [shape: bf16[32,16], index: 4, kind: input, shape index: {}]   ;;  %s850_s5 = inlined_call_operand.vmem [shape: f32[1,16], index: 5, kind: input, shape index: {}]   ;;  %s851_s6 = inlined_call_operand.vmem [shape: bf16[8,32], index: 6, kind: input, shape index: {}]   ;;  %s852_s7 = inlined_call_operand.vmem [shape: f32[1,32], index: 7, kind: input, shape index: {}]   ;;  %s853_s8 = inlined_call_operand.vmem [shape: bf16[32,32], index: 8, kind: input, shape index: {}]   ;;  %s854_s9 = inlined_call_operand.vmem [shape: f32[1,32], index: 9, kind: input, shape index: {}]   ;;  %s855_s10 = inlined_call_operand.hbm [shape: bf16[8,32], index: 10, kind: output, shape index: {0}]   ;;  %s856_s11 = inlined_call_operand.hbm [shape: f32[8,16], index: 11, kind: output, shape index: {1}]   ;;  %s857_s12 = inlined_call_operand.hbm [shape: f32[8,32], index: 12, kind: output, shape index: {2}]  }
   0x1   :  { %19 = vsyncpa [#allocation6], 0 }
   0x2   :  { %20 = vsyncpa [#allocation4], 0 }
   0x3   :  { %21 = vsyncpa [#allocation9], 0  ;;  %s647_s21 = smov [#allocation2]   ;;  %s648_s23 = smov [#allocation5]  }
   0x4   :  { %s28_s22 = sshll.u32 %s647_s21, 4  ;;  %s39_s24 = sshll.u32 %s648_s23, 4  ;;  %s29_s22 = int_to_ptr.vmem [resolvable:$true] %s28_s22  ;;  %s721_s24 = int_to_ptr.vmem [resolvable:$true] %s39_s24 }
   0x5   :  { %s529_s27 = scalar_lea.hbm %s845_s0, 64 }
   0x6   :  { %p530_p0 = scmp.ne.s32.totalorder %s845_s0, %s529_s27  ;;  %p533_p1 = scmp.lt.u32.totalorder %s529_s27, %s845_s0 }
   0x8   :  { %p535_p2 = pnand %p533_p1, %p530_p0 }
   0xa   :  { %538 = shalt.err (!%p535_p2)
}
   0xb   :  { %s539_s14 = scalar_lea.vmem %s29_s22, 64  ;;  %p544_p4 = scmp.lt.s32.totalorder %s29_s22, %s29_s22 }
   0xc   :  { %p540_p3 = scmp.ne.s32.totalorder %s29_s22, %s539_s14  ;;  %p545_p5 = scmp.lt.s32.totalorder %s539_s14, %s539_s14 }
   0xe   :  { %p546_p6 = por %p545_p5, %p544_p4 }
  0x10   :  { %p547_p7 = pnand %p546_p6, %p540_p3 }
  0x12   :  { %550 = shalt.err (!%p547_p7)
}
  0x13   :  { %31 = dma.hbm_to_vmem [thread:$0]  %s845_s0, 64, %s29_s22, [#allocation3]  }
  0x14   :  { %s551_s19 = scalar_lea.hbm %s847_s2, 256 }
  0x15   :  { %p552_p8 = scmp.ne.s32.totalorder %s847_s2, %s551_s19  ;;  %p555_p9 = scmp.lt.u32.totalorder %s551_s19, %s847_s2 }
  0x17   :  { %p557_p10 = pnand %p555_p9, %p552_p8 }
  0x19   :  { %560 = shalt.err (!%p557_p10)
}
  0x1a   :  { %s561_s26 = scalar_lea.vmem %s721_s24, 256  ;;  %p566_p12 = scmp.lt.s32.totalorder %s721_s24, %s721_s24 }
  0x1b   :  { %p562_p11 = scmp.ne.s32.totalorder %s721_s24, %s561_s26  ;;  %p567_p13 = scmp.lt.s32.totalorder %s561_s26, %s561_s26 }
  0x1d   :  { %p568_p0 = por %p567_p13, %p566_p12 }
  0x1f   :  { %p569_p1 = pnand %p568_p0, %p562_p11 }
  0x21   :  { %572 = shalt.err (!%p569_p1)
}
  0x22   :  { %s649_s0 = smov 64   ;;  %s650_s22 = smov 4  }
  0x23   :  { %45 = dma.hbm_to_vmem [thread:$0]  %s847_s2, 256, %s721_s24, [#allocation6], %s649_s0, %s649_s0, %s650_s22  }
  0x24   :  { %639 = dma.done.wait [#allocation3], 64  }
  0x25   :  { %640 = vsyncadd [#allocation3], 4294967232 }
  0x26   :  { %641 = dma.done.wait [#allocation6], 256  }
  0x27   :  { %642 = vsyncadd [#allocation6], 4294967040  ;;  %v651_v0 = vmov 0.0   ;;  %vm652_vm0 = vmmov 0   ;;  %v517_v1 = vld [vmem:[#allocation5] sm:$0xff]   ;;  %v518_v2 = vld [vmem:[#allocation5 + $0x8] sm:$0xff]  }
  0x28   :  { %478 = vmatprep.subr.bf16.mxu1 %v651_v0  ;;  %482 = vmatprep.mubr.msk.bf16.mxu1 %vm652_vm0, %v651_v0  ;;  %v519_v3 = vld [vmem:[%s846_s1] sm:$0xff]   ;;  %vm84_vm1 = vcmask 261120   ;;  %v520_v5 = vld [vmem:[%s846_s1 + $0x8] sm:$0xff]   ;;  %vm277_vm2 = vcmask 1043456   ;;  %vm129_vm3 = vcmask 257024   ;;  %vm262_vm4 = vcmask 130048  }
  0x29   :  { %470 = vmatprep.subr.bf16.mxu0 %v651_v0  ;;  %474 = vmatprep.mubr.msk.bf16.mxu0 %vm652_vm0, %v651_v0  ;;  %v67_v4 = vld [vmem:[#allocation2] sm:$0xf]  ;;  %v522_v7 = vld [vmem:[%s849_s4 + $0x8] sm:$0xff]   ;;  %vm273_vm5 = vcmask 64512   ;;  %s654_s0 = smov [#allocation7]  }
  0x2a   :  { %479 = vmatpush3.bf16.msra.mxu1 %v517_v1  ;;  %471 = vmatpush3.bf16.msra.mxu0 %v519_v3  ;;  %v521_v6 = vld [vmem:[%s849_s4] sm:$0xff]   ;;  %v524_v31 = vld [vmem:[%s853_s8 + $0x8] sm:$0xff]   ;;  %s401_s22 = sshll.u32 %s654_s0, 4  ;;  %s402_s22 = int_to_ptr.vmem [resolvable:$true] %s401_s22 }
  0x2b   :  { %480 = vmatprep.subr.bf16.mxu1 %v651_v0  ;;  %472 = vmatprep.subr.bf16.mxu0 %v651_v0  ;;  %v264_v8 = vld [vmem:[%s851_s6] sm:$0xf] }
  0x2c   :  { %v279_v9 = vsel %vm277_vm2, %v264_v8, 0  ;;  %v441_v10 = vld [vmem:[%s848_s3] ss:$0 sm:$0xff] }
  0x2d   :  { %v445_v23 = vld [vmem:[%s850_s5] ss:$0 sm:$0xff] }
  0x2e   :  { %481 = vmatpush3.bf16.msra.mxu1 %v518_v2  ;;  %473 = vmatpush3.bf16.msra.mxu0 %v520_v5  ;;  %v523_v30 = vld [vmem:[%s853_s8] sm:$0xff]   ;;  %s653_s8 = smov [#allocation8]  }
  0x2f   :  { %494 = vmatprep.subr.bf16.mxu1 %v651_v0  ;;  %486 = vmatprep.subr.bf16.mxu0 %v651_v0  ;;  %v449_v32 = vld [vmem:[%s852_s7] ss:$0 sm:$0xff]  ;;  %s411_s26 = sshll.u32 %s653_s8, 4  ;;  %s412_s26 = int_to_ptr.vmem [resolvable:$true] %s411_s26 }
  0x30   :  { %s573_s7 = scalar_lea.vmem %s412_s26, 128  ;;  %p578_p3 = scmp.lt.s32.totalorder %s412_s26, %s412_s26 }
  0x31   :  { %483 = vmatmul.mubr.msk.bf16.vlgmr.msra.gmra.mrb[0].mxu1 %vm84_vm1, %v67_v4  ;;  %475 = vmatmul.mubr.msk.bf16.vlgmr.msra.gmra.mrb[0].mxu0 %vm84_vm1, %v67_v4  ;;  %p574_p2 = scmp.ne.s32.totalorder %s412_s26, %s573_s7  ;;  %p579_p4 = scmp.lt.s32.totalorder %s573_s7, %s573_s7 }
  0x32   :  { %496 = vmatprep.mubr.msk.bf16.mxu1 %vm652_vm0, %v651_v0  ;;  %487 = vmatpush3.bf16.msra.mxu0 %v521_v6 }
  0x33   :  { %490 = vmatprep.mubr.msk.bf16.mxu0 %vm652_vm0, %v651_v0  ;;  %488 = vmatprep.subr.bf16.mxu0 %v651_v0  ;;  %p580_p5 = por %p579_p4, %p578_p3 }
  0x34   :  { %495 = vmatpush3.bf16.msra.mxu1 %v279_v9 }
  0x35   :  { %p581_p6 = pnand %p580_p5, %p574_p2 }
  0x36   :  { %489 = vmatpush3.bf16.msra.mxu0 %v522_v7 }
  0x37   :  { %500 = vmatprep.subr.bf16.mxu0 %v651_v0 }
 0x104   :  { %v188_v11 = vpop.f32.mrb[0].mxu1  ;;  %v122_v17 = vpop.f32.mrb[0].mxu0 }
 0x105   :  { %v189_v12 = vadd.f32 %v441_v10, %v188_v11  ;;  %v484_v13 = vpop.f32.mrb[1].mxu1  ;;  %v476_v18 = vpop.f32.mrb[1].mxu0  ;;  %v128_v22 = vpack.c.bf16 %v122_v17, %v122_v17 }
 0x106   :  { %v191_v14 = vpop.f32.mrb[2].mxu1  ;;  %v125_v20 = vpop.f32.mrb[2].mxu0 }
 0x107   :  { %v194_v15 = vmax.f32 %v189_v12, 0.0  ;;  %v485_v16 = vpop.f32.mrb[3].mxu1  ;;  %v477_v21 = vpop.f32.mrb[3].mxu0  ;;  %130 = vst.msk [vmem:[#allocation7] sm:$0xf] %vm129_vm3, %v128_v22 }
 0x109   :  { %v199_v19 = vpack.c.bf16 %v194_v15, %v194_v15 }
 0x10b   :  { %491 = vmatmul.mubr.msk.bf16.vlgmr.msra.gmra.mrb[4].mxu0 %vm84_vm1, %v199_v19 }
 0x10c   :  { %504 = vmatprep.mubr.msk.bf16.mxu0 %vm652_vm0, %v651_v0  ;;  %501 = vmatpush3.bf16.msra.mxu0 %v523_v30 }
 0x10d   :  { %502 = vmatprep.subr.bf16.mxu0 %v651_v0 }
 0x110   :  { %503 = vmatpush3.bf16.msra.mxu0 %v524_v31 }
 0x1de   :  { %v256_v24 = vpop.f32.mrb[4].mxu0 }
 0x1df   :  { %v257_v25 = vadd.f32 %v445_v23, %v256_v24  ;;  %v492_v26 = vpop.f32.mrb[5].mxu0 }
 0x1e0   :  { %v259_v27 = vpop.f32.mrb[6].mxu0 }
 0x1e1   :  { %v265_v28 = vpack.c.bf16 %v257_v25, %v257_v25  ;;  %v493_v29 = vpop.f32.mrb[7].mxu0  ;;  %263 = vst.msk [vmem:[#allocation8] sm:$0xff] %vm262_vm4, %v257_v25 }
 0x1e3   :  { %497 = vmatmul.mubr.msk.bf16.vlgmr.msra.gmra.mrb[4].mxu1 %vm273_vm5, %v265_v28 }
 0x2b6   :  { %v315_v33 = vpop.f32.mrb[4].mxu1 }
 0x2b7   :  { %v316_v34 = vadd.f32 %v449_v32, %v315_v33  ;;  %v498_v35 = vpop.f32.mrb[5].mxu1 }
 0x2b8   :  { %v318_v36 = vpop.f32.mrb[6].mxu1 }
 0x2b9   :  { %v451_v37 = vmul.f32 -1.442695, %v316_v34  ;;  %v499_v38 = vpop.f32.mrb[7].mxu1 }
 0x2bb   :  { %525 = vpow2.f32 %v451_v37 }
 0x2c5   :  { %v526_v39 = vpop.eup %525 }
 0x2c6   :  { %v324_v40 = vadd.f32 1.0, %v526_v39 }
 0x2c8   :  { %527 = vrcp.f32 %v324_v40 }
 0x2d2   :  { %v528_v41 = vpop.eup %527 }
 0x2d3   :  { %v331_v42 = vpack.c.bf16 %v528_v41, %v528_v41 }
 0x2d5   :  { %505 = vmatmul.mubr.msk.bf16.vlgmr.msra.gmra.mrb[8].mxu0 %vm84_vm1, %v331_v42 }
 0x2d6   :  { %584 = shalt.err (!%p581_p6)
}
 0x2d7   :  { %s585_s2 = scalar_lea.hbm %s856_s11, 128 }
 0x2d8   :  { %p586_p7 = scmp.ne.s32.totalorder %s856_s11, %s585_s2  ;;  %p589_p8 = scmp.lt.u32.totalorder %s585_s2, %s856_s11 }
 0x2da   :  { %p591_p9 = pnand %p589_p8, %p586_p7 }
 0x2dc   :  { %594 = shalt.err (!%p591_p9)
}
 0x2dd   :  { %414 = dma.vmem_to_hbm [thread:$0]  %s412_s26, 128, %s856_s11, [#allocation9]  }
 0x2de   :  { %s595_s15 = scalar_lea.vmem %s402_s22, 64  ;;  %p600_p11 = scmp.lt.s32.totalorder %s402_s22, %s402_s22 }
 0x2df   :  { %p596_p10 = scmp.ne.s32.totalorder %s402_s22, %s595_s15  ;;  %p601_p12 = scmp.lt.s32.totalorder %s595_s15, %s595_s15 }
 0x2e1   :  { %p602_p13 = por %p601_p12, %p600_p11 }
 0x2e3   :  { %p603_p0 = pnand %p602_p13, %p596_p10 }
 0x2e5   :  { %606 = shalt.err (!%p603_p0)
}
 0x2e6   :  { %s607_s18 = scalar_lea.hbm %s855_s10, 64 }
 0x2e7   :  { %p608_p1 = scmp.ne.s32.totalorder %s855_s10, %s607_s18  ;;  %p611_p2 = scmp.lt.u32.totalorder %s607_s18, %s855_s10 }
 0x2e9   :  { %p613_p3 = pnand %p611_p2, %p608_p1 }
 0x2eb   :  { %616 = shalt.err (!%p613_p3)
}
 0x2ec   :  { %404 = dma.vmem_to_hbm [thread:$0]  %s402_s22, 64, %s855_s10, [#allocation4]   ;;  %v452_v43 = vld [vmem:[%s854_s9] ss:$0 sm:$0xff] }
 0x2ed   :  { %s655_s5 = smov [#allocation10]  }
 0x2ee   :  { %s421_s25 = sshll.u32 %s655_s5, 4  ;;  %s422_s25 = int_to_ptr.vmem [resolvable:$true] %s421_s25 }
 0x2ef   :  { %s617_s8 = scalar_lea.vmem %s422_s25, 128  ;;  %p622_p5 = scmp.lt.s32.totalorder %s422_s25, %s422_s25 }
 0x2f0   :  { %p618_p4 = scmp.ne.s32.totalorder %s422_s25, %s617_s8  ;;  %p623_p6 = scmp.lt.s32.totalorder %s617_s8, %s617_s8 }
 0x2f2   :  { %p624_p7 = por %p623_p6, %p622_p5 }
 0x2f4   :  { %p625_p8 = pnand %p624_p7, %p618_p4 }
 0x3a8   :  { %v388_v44 = vpop.f32.mrb[8].mxu0 }
 0x3a9   :  { %v389_v45 = vadd.f32 %v452_v43, %v388_v44  ;;  %v506_v46 = vpop.f32.mrb[9].mxu0 }
 0x3aa   :  { %v391_v47 = vpop.f32.mrb[10].mxu0 }
 0x3ab   :  { %394 = vst.msk [vmem:[#allocation10] sm:$0xff] %vm84_vm1, %v389_v45  ;;  %v507_v48 = vpop.f32.mrb[11].mxu0 }
 0x3ac   :  { %628 = shalt.err (!%p625_p8)
}
 0x3ad   :  { %s629_s9 = scalar_lea.hbm %s857_s12, 128 }
 0x3ae   :  { %p630_p9 = scmp.ne.s32.totalorder %s857_s12, %s629_s9  ;;  %p633_p10 = scmp.lt.u32.totalorder %s629_s9, %s857_s12 }
 0x3b0   :  { %p635_p11 = pnand %p633_p10, %p630_p9 }
 0x3b2   :  { %638 = shalt.err (!%p635_p11)
}
 0x3b3   :  { %424 = dma.vmem_to_hbm [thread:$0]  %s422_s25, 128, %s857_s12, [#allocation9]  }
 0x3b4   :  { %643 = dma.done.wait [#allocation4], 64  }
 0x3b5   :  { %644 = vsyncadd [#allocation4], 4294967232 }
 0x3b6   :  { %645 = dma.done.wait [#allocation9], 256  }
 0x3b7   :  { %646 = vsyncadd [#allocation9], 4294967040 }
 0x3b8   :  { %434 = vsyncpa [#allocation3], 1 }
 0x3b9   :  { %435 = vsyncpa [#allocation6], 1 }
 0x3ba   :  { %436 = vsyncpa [#allocation4], 1 }
 0x3bb   :  { %437 = vsyncpa [#allocation9], 1 }

</bundles_post_ra>
